<compile_context>
chip_gen: v5e
topology: v5e:2x2
jax: 0.10.0
libtpu: 0.0.40
codegen_flags: <defaults>
</compile_context>

<pallas_src>
import math

import jax
import jax.numpy as jnp
from jax.experimental import pallas as pl
from jax.experimental.pallas import tpu as pltpu


# --------------------------------------------------------------------------- #
# Generic tiled matmul (used for Q, fused K|V, and output projections)         #
# --------------------------------------------------------------------------- #
def _matmul_kernel(x_ref, w_ref, o_ref, acc_ref):
    @pl.when(pl.program_id(2) == 0)
    def _():
        acc_ref[...] = jnp.zeros(acc_ref.shape, dtype=acc_ref.dtype)

    acc_ref[...] += jnp.dot(x_ref[...], w_ref[...],
                            preferred_element_type=jnp.float32)

    @pl.when(pl.program_id(2) == pl.num_programs(2) - 1)
    def _():
        o_ref[...] = acc_ref[...].astype(o_ref.dtype)


def _pick_tile(dim, target):
    """Largest tile <= target that cleanly divides `dim` (falls back to full dim)."""
    if dim <= target:
        return dim
    return target if dim % target == 0 else dim


def tiled_matmul(x, w, *, out_dtype, tm=256, tn=256, tk=512):
    """y = x @ w with (tm, tn, tk) tiling, f32 accumulation."""
    M, K = x.shape
    K2, N = w.shape
    assert K == K2
    tm = _pick_tile(M, tm)
    tn = _pick_tile(N, tn)
    tk = _pick_tile(K, tk)

    cost = pl.CostEstimate(
        flops=2 * M * N * K,
        transcendentals=0,
        bytes_accessed=(M * K * x.dtype.itemsize
                        + K * N * w.dtype.itemsize
                        + M * N * jnp.dtype(out_dtype).itemsize),
    )

    return pl.pallas_call(
        _matmul_kernel,
        out_shape=jax.ShapeDtypeStruct((M, N), out_dtype),
        grid_spec=pltpu.PrefetchScalarGridSpec(
            num_scalar_prefetch=0,
            grid=(M // tm, N // tn, K // tk),          # reduction (K) innermost
            in_specs=[pl.BlockSpec((tm, tk), lambda i, j, k: (i, k)),
                      pl.BlockSpec((tk, tn), lambda i, j, k: (k, j))],
            out_specs=pl.BlockSpec((tm, tn), lambda i, j, k: (i, j)),
            scratch_shapes=[pltpu.VMEM((tm, tn), jnp.float32)],
        ),
        compiler_params=pltpu.CompilerParams(
            dimension_semantics=("parallel", "parallel", "arbitrary")),
        cost_estimate=cost,
    )(x, w)


# --------------------------------------------------------------------------- #
# Flash-style multi-head attention core (heads batched, online softmax)        #
# --------------------------------------------------------------------------- #
def _attention_kernel(q_ref, k_ref, v_ref, o_ref, m_sc, l_sc, acc_sc):
    kv = pl.program_id(1)

    @pl.when(kv == 0)
    def _():
        m_sc[...] = jnp.full(m_sc.shape, -jnp.inf, dtype=m_sc.dtype)
        l_sc[...] = jnp.zeros(l_sc.shape, dtype=l_sc.dtype)
        acc_sc[...] = jnp.zeros(acc_sc.shape, dtype=acc_sc.dtype)

    # Batched over heads, contraction on the last (lane) dim of both operands:
    # no in-kernel transpose, single MXU-fed einsum.  Scale is pre-folded into W_q.
    s = jnp.einsum('hqd,hkd->hqk', q_ref[...], k_ref[...],
                   preferred_element_type=jnp.float32)          # f32 scores

    m_prev = m_sc[...]
    m_new = jnp.maximum(m_prev, s.max(axis=-1, keepdims=True))
    alpha = jnp.exp(m_prev - m_new)                              # f32 softmax math
    p = jnp.exp(s - m_new)
    l_sc[...] = alpha * l_sc[...] + p.sum(axis=-1, keepdims=True)
    acc_sc[...] = alpha * acc_sc[...] + jnp.einsum(
        'hqk,hkd->hqd', p.astype(v_ref.dtype), v_ref[...],
        preferred_element_type=jnp.float32)
    m_sc[...] = m_new

    @pl.when(kv == pl.num_programs(1) - 1)
    def _():
        o_ref[...] = (acc_sc[...] *
                      pl.reciprocal(l_sc[...], approx=True)).astype(o_ref.dtype)


# --------------------------------------------------------------------------- #
# Wrapper reproducing MultiHeadAttention.forward (eval mode)                   #
# --------------------------------------------------------------------------- #
def multi_head_attention(input_embeddings, history_hidden,
                         wq_t, wk_t, wv_t, wo_t, *, num_heads,
                         tq=128, tkv=128):
    """input_embeddings: [Lq, F], history_hidden: [Lk, F], w*_t: [F, F] (pre-transposed)."""
    Lq, F = input_embeddings.shape
    Lk = history_hidden.shape[0]
    H = num_heads
    D = F // H
    out_dtype = input_embeddings.dtype
    cdt = jnp.bfloat16                       # MXU operand dtype (f32 accumulation)

    # Fold 1/sqrt(D) into W_q (exact by linearity) instead of scaling [Lq,Lk] scores.
    scale = 1.0 / math.sqrt(D)
    xq = input_embeddings.astype(cdt)
    xkv = history_hidden.astype(cdt)
    wq_s = (wq_t * scale).astype(cdt)
    wkv = jnp.concatenate([wk_t, wv_t], axis=1).astype(cdt)      # fused K|V RHS [F, 2F]

    # Projections (tiled, pipelined matmuls).
    q = tiled_matmul(xq, wq_s, out_dtype=cdt)                    # [Lq, F]
    kv = tiled_matmul(xkv, wkv, out_dtype=cdt)                   # [Lk, 2F]
    k, v = kv[:, :F], kv[:, F:]

    # [L, F] -> [H, L, D]: head-major, D on lanes (lane-dense batched attention).
    qh = q.reshape(Lq, H, D).transpose(1, 0, 2)
    kh = k.reshape(Lk, H, D).transpose(1, 0, 2)
    vh = v.reshape(Lk, H, D).transpose(1, 0, 2)

    tq = _pick_tile(Lq, tq)
    tkv = _pick_tile(Lk, tkv)

    cost = pl.CostEstimate(
        flops=4 * H * Lq * Lk * D,
        transcendentals=H * Lq * Lk,
        bytes_accessed=2 * (H * Lq * D + 2 * H * Lk * D + H * Lq * D),
    )

    attn = pl.pallas_call(
        _attention_kernel,
        out_shape=jax.ShapeDtypeStruct((H, Lq, D), cdt),
        grid_spec=pltpu.PrefetchScalarGridSpec(
            num_scalar_prefetch=0,
            grid=(Lq // tq, Lk // tkv),                          # Lk (reduction) innermost
            in_specs=[pl.BlockSpec((H, tq, D), lambda qi, ki: (0, qi, 0)),
                      pl.BlockSpec((H, tkv, D), lambda qi, ki: (0, ki, 0)),
                      pl.BlockSpec((H, tkv, D), lambda qi, ki: (0, ki, 0))],
            out_specs=pl.BlockSpec((H, tq, D), lambda qi, ki: (0, qi, 0)),
            scratch_shapes=[pltpu.VMEM((H, tq, 1), jnp.float32),   # m
                            pltpu.VMEM((H, tq, 1), jnp.float32),   # l
                            pltpu.VMEM((H, tq, D), jnp.float32)],  # acc
        ),
        compiler_params=pltpu.CompilerParams(
            dimension_semantics=("parallel", "arbitrary")),
        cost_estimate=cost,
    )(qh, kh, vh)

    # torch.cat(head_outputs, dim=1): head h occupies feature columns [h*D, (h+1)*D).
    head_scores = attn.transpose(1, 0, 2).reshape(Lq, F)
    # TODO(synk): nn.Dropout is identity in eval/inference mode; not applied here.
    out = tiled_matmul(head_scores, wo_t.astype(cdt), out_dtype=jnp.float32)
    return out.astype(out_dtype)


# --------------------------------------------------------------------------- #
# Pure-JAX reference (same bf16 operand quantization, f32 math)                #
# --------------------------------------------------------------------------- #
def _reference(x_q, x_kv, wq_t, wk_t, wv_t, wo_t, num_heads):
    q32 = lambda a: a.astype(jnp.bfloat16).astype(jnp.float32)
    x_q, x_kv = q32(x_q), q32(x_kv)
    wq_t, wk_t, wv_t, wo_t = map(q32, (wq_t, wk_t, wv_t, wo_t))
    F = x_q.shape[1]
    D = F // num_heads
    q = x_q @ wq_t
    k = x_kv @ wk_t
    v = x_kv @ wv_t
    outs = []
    for h in range(num_heads):
        lo, hi = h * D, (h + 1) * D
        s = (q[:, lo:hi] @ k[:, lo:hi].T) / jnp.sqrt(jnp.float32(D))
        p = jax.nn.softmax(s, axis=-1)
        outs.append(p @ v[:, lo:hi])
    return jnp.concatenate(outs, axis=1) @ wo_t


if __name__ == "__main__":
    # Small shapes consistent with the module's 2-D forward:
    #   input_embeddings : [Lq, F]      history_hidden : [Lk, F]
    num_features = 32
    num_heads = 4
    Lq, Lk = 8, 8

    key = jax.random.PRNGKey(0)
    k_x, k_h, k_q, k_k, k_v, k_o = jax.random.split(key, 6)

    x_q = jax.random.normal(k_x, (Lq, num_features), dtype=jnp.float32)
    x_kv = jax.random.normal(k_h, (Lk, num_features), dtype=jnp.float32)

    # nn.Linear(F, F, bias=False) init: U(-1/sqrt(F), 1/sqrt(F)); store transpose so y = x @ W_t.
    bound = 1.0 / math.sqrt(num_features)

    def init_w(k):
        w = jax.random.uniform(k, (num_features, num_features),
                               dtype=jnp.float32, minval=-bound, maxval=bound)
        return w.T

    wq_t, wk_t, wv_t, wo_t = (init_w(k) for k in (k_q, k_k, k_v, k_o))

    out = multi_head_attention(x_q, x_kv, wq_t, wk_t, wv_t, wo_t,
                               num_heads=num_heads)
    out = jax.block_until_ready(out)

    ref = _reference(x_q, x_kv, wq_t, wk_t, wv_t, wo_t, num_heads)
    assert out.shape == (Lq, num_features)
    # bf16 MXU operands -> loosened tolerance vs the f32-math reference.
    assert jnp.allclose(out, ref, atol=2e-2, rtol=2e-2), \
        float(jnp.max(jnp.abs(out - ref)))

    print("KERNEL_OK")
</pallas_src>

<mosaic_0001>
module attributes {stable_mosaic.version = 11 : i64} {
  func.func @_matmul_kernel(%arg0: i32, %arg1: i32, %arg2: i32, %arg3: memref<8x32xbf16, #tpu.memory_space<vmem>>, %arg4: memref<32x32xbf16, #tpu.memory_space<vmem>>, %arg5: memref<8x32xbf16, #tpu.memory_space<vmem>>, %arg6: memref<8x32xf32, #tpu.memory_space<vmem>>) attributes {dimension_semantics = [#tpu.dimension_semantics<parallel>, #tpu.dimension_semantics<parallel>, #tpu.dimension_semantics<arbitrary>], iteration_bounds = array<i64: 1, 1, 1>, scalar_prefetch = 0 : i64, scratch_operands = 1 : i64, tpu.core_type = #tpu.core_type<tc>, window_params = [{transform_indices = @transform_0, window_bounds = array<i64: 8, 32>}, {transform_indices = @transform_1, window_bounds = array<i64: 32, 32>}, {transform_indices = @transform_2, window_bounds = array<i64: 8, 32>}]} {
    %c0_i32 = arith.constant 0 : i32
    %0 = arith.cmpi eq, %arg2, %c0_i32 : i32
    %1 = arith.extui %0 : i1 to i32
    %c0_i32_0 = arith.constant 0 : i32
    %2 = arith.cmpi ne, %1, %c0_i32_0 : i32
    scf.if %2 {
      %cst_10 = arith.constant 0.000000e+00 : f32
      %12 = vector.broadcast %cst_10 : f32 to vector<8x32xf32>
      %c0_11 = arith.constant 0 : index
      %c0_12 = arith.constant 0 : index
      %13 = vector.load %arg6[%c0_11, %c0_12] : memref<8x32xf32, #tpu.memory_space<vmem>>, vector<8x32xf32>
      tpu.vector_store %arg6[%c0_11, %c0_12], %12 {strides = array<i32>} : memref<8x32xf32, #tpu.memory_space<vmem>>, vector<8x32xf32>,
    } else {
    }
    %c0 = arith.constant 0 : index
    %c0_1 = arith.constant 0 : index
    %3 = vector.load %arg6[%c0, %c0_1] : memref<8x32xf32, #tpu.memory_space<vmem>>, vector<8x32xf32>
    %c0_2 = arith.constant 0 : index
    %c0_3 = arith.constant 0 : index
    %4 = vector.load %arg3[%c0_2, %c0_3] : memref<8x32xbf16, #tpu.memory_space<vmem>>, vector<8x32xbf16>
    %c0_4 = arith.constant 0 : index
    %c0_5 = arith.constant 0 : index
    %5 = vector.load %arg4[%c0_4, %c0_5] : memref<32x32xbf16, #tpu.memory_space<vmem>>, vector<32x32xbf16>
    %cst = arith.constant dense<0.000000e+00> : vector<8x32xf32>
    %6 = tpu.matmul %4, %5, %cst {dimension_numbers = #tpu.dot_dimension_numbers<[1], [0], [0], [1], [0, 0, 1, 1], [], []>} : vector<8x32xbf16>, vector<32x32xbf16>, vector<8x32xf32> -> vector<8x32xf32>
    %7 = arith.addf %3, %6 : vector<8x32xf32>
    %c0_6 = arith.constant 0 : index
    %c0_7 = arith.constant 0 : index
    %8 = vector.load %arg6[%c0_6, %c0_7] : memref<8x32xf32, #tpu.memory_space<vmem>>, vector<8x32xf32>
    tpu.vector_store %arg6[%c0_6, %c0_7], %7 {strides = array<i32>} : memref<8x32xf32, #tpu.memory_space<vmem>>, vector<8x32xf32>,
    %c0_i32_8 = arith.constant 0 : i32
    %9 = arith.cmpi eq, %arg2, %c0_i32_8 : i32
    %10 = arith.extui %9 : i1 to i32
    %c0_i32_9 = arith.constant 0 : i32
    %11 = arith.cmpi ne, %10, %c0_i32_9 : i32
    scf.if %11 {
      %c0_10 = arith.constant 0 : index
      %c0_11 = arith.constant 0 : index
      %12 = vector.load %arg6[%c0_10, %c0_11] : memref<8x32xf32, #tpu.memory_space<vmem>>, vector<8x32xf32>
      %13 = arith.truncf %12 : vector<8x32xf32> to vector<8x32xbf16>
      %c0_12 = arith.constant 0 : index
      %c0_13 = arith.constant 0 : index
      %14 = vector.load %arg5[%c0_12, %c0_13] : memref<8x32xbf16, #tpu.memory_space<vmem>>, vector<8x32xbf16>
      tpu.vector_store %arg5[%c0_12, %c0_13], %13 {strides = array<i32>} : memref<8x32xbf16, #tpu.memory_space<vmem>>, vector<8x32xbf16>,
    } else {
    }
    return
  }
  func.func @transform_0(%arg0: i32, %arg1: i32, %arg2: i32) -> (i32, i32) {
    %c0_i32 = arith.constant 0 : i32
    return %arg0, %arg2 : i32, i32
  }
  func.func @transform_1(%arg0: i32, %arg1: i32, %arg2: i32) -> (i32, i32) {
    %c0_i32 = arith.constant 0 : i32
    return %arg2, %arg1 : i32, i32
  }
  func.func @transform_2(%arg0: i32, %arg1: i32, %arg2: i32) -> (i32, i32) {
    %c0_i32 = arith.constant 0 : i32
    return %arg0, %arg1 : i32, i32
  }
}

</mosaic_0001>

<bundles_post_ra>
// kernel: tpu_custom_call.1
= control target key start
LH: loop header
LB: loop body
LE: loop exit
PB: predicated region body
PF: predicated region fallthrough
CT: control target
= control target key end

     0   :  { %7 = vsyncpa [#allocation4], 0  ;;  %s236_s0 = inlined_call_operand.hbm [shape: bf16[8,32], index: 0, kind: input, shape index: {}]   ;;  %s237_s1 = inlined_call_operand.hbm [shape: bf16[32,32], index: 1, kind: input, shape index: {}]   ;;  %s238_s2 = inlined_call_operand.hbm [shape: bf16[8,32], index: 2, kind: output, shape index: {}]  }
   0x1   :  { %8 = vsyncpa [#allocation7], 0 }
   0x2   :  { %9 = vsyncpa [#allocation5], 0  ;;  %s15_s11 = sshll.u32 %s236_s0, 4  ;;  %s206_s12 = smov [#allocation3]   ;;  %s16_s11 = int_to_ptr.hbm [resolvable:$true] %s15_s11 }
   0x3   :  { %s17_s13 = sshll.u32 %s206_s12, 4  ;;  %s25_s16 = sshll.u32 %s237_s1, 4  ;;  %s18_s13 = int_to_ptr.vmem [resolvable:$true] %s17_s13  ;;  %s26_s16 = int_to_ptr.hbm [resolvable:$true] %s25_s16 }
   0x4   :  { %20 = dma.hbm_to_vmem [thread:$0]  %s16_s11, 64, %s18_s13, [#allocation4]  }
   0x5   :  { %s207_s17 = smov [#allocation6]   ;;  %s208_s19 = smov 64  }
   0x6   :  { %s27_s18 = sshll.u32 %s207_s17, 4  ;;  %s209_s20 = smov 4   ;;  %s28_s18 = int_to_ptr.vmem [resolvable:$true] %s27_s18 }
   0x7   :  { %33 = dma.hbm_to_vmem [thread:$0]  %s26_s16, 256, %s28_s18, [#allocation7], %s208_s19, %s208_s19, %s209_s20  }
   0x8   :  { %200 = dma.done.wait [#allocation4], 64  }
   0x9   :  { %201 = vsyncadd [#allocation4], 4294967232 }
   0xa   :  { %202 = dma.done.wait [#allocation7], 256  }
   0xb   :  { %203 = vsyncadd [#allocation7], 4294967040  ;;  %vm47_vm0 = vcmask 261120   ;;  %v210_v0 = vmov 0.0   ;;  %v121_v1 = vld [vmem:[#allocation6 + $0x8] sm:$0xff]  ;;  %v120_v2 = vld [vmem:[#allocation6] sm:$0xff] }
   0xc   :  { %48 = vst.msk [vmem:[#allocation2] sm:$0xff] %vm47_vm0, %v210_v0  ;;  %77 = vmatpush.bf16.msra.mxu0 %v121_v1  ;;  %v50_v3 = vld [vmem:[#allocation3] sm:$0xf]  ;;  %s211_s0 = smov [#allocation8]   ;;  %s100_s23 = sshll.u32 %s238_s2, 4  ;;  %vm91_vm1 = vcmask 257024   ;;  %s101_s23 = int_to_ptr.hbm [resolvable:$true] %s100_s23 }
   0xd   :  { %s98_s1 = sshll.u32 %s211_s0, 4  ;;  %s99_s1 = int_to_ptr.vmem [resolvable:$true] %s98_s1 }
  0x10   :  { %78 = vmatpush.bf16.msra.mxu0 %v120_v2 }
  0x13   :  { %119 = vmatmul.msk.bf16.vlgmr.msra.gmra.mxu0 %vm47_vm0, %v50_v3  ;;  %v49_v4 = vld [vmem:[#allocation2] sm:$0xff] }
  0x90   :  { %v80_v5 = vpop.f32.mrf.mxu0 }
  0x91   :  { %v84_v6 = vadd.f32 %v80_v5, %v49_v4 }
  0x93   :  { %85 = vst.msk [vmem:[#allocation2] sm:$0xff] %vm47_vm0, %v84_v6 }
  0x98   :  { %v82_v7 = vpop.f32.mrf.mxu0 }
  0x9a   :  { %v89_v8 = vld [vmem:[#allocation2] sm:$0xff] }
  0x9b   :  { %v90_v9 = vpack.c.bf16 %v89_v8, %v89_v8 }
  0x9d   :  { %92 = vst.msk [vmem:[#allocation8] sm:$0xf] %vm91_vm1, %v90_v9 }
  0x9e   :  { %103 = dma.vmem_to_hbm [thread:$0]  %s99_s1, 64, %s101_s23, [#allocation5]  }
  0x9f   :  { %204 = dma.done.wait [#allocation5], 64  }
  0xa0   :  { %205 = vsyncadd [#allocation5], 4294967232 }
  0xa1   :  { %108 = vsyncpa [#allocation4], 1 }
  0xa2   :  { %109 = vsyncpa [#allocation7], 1 }
  0xa3   :  { %110 = vsyncpa [#allocation5], 1 }

</bundles_post_ra>
